<compile_context>
chip_gen: v7x
topology: tpu7x:2x2x1
jax: 0.10.0
libtpu: 0.0.40
codegen_flags: <defaults>
</compile_context>

<pallas_src>
import functools

import jax
import jax.numpy as jnp
from jax.experimental import pallas as pl
from jax.experimental.pallas import tpu as pltpu


def _round_up(n, m):
    return ((n + m - 1) // m) * m


def _pad2(a, rows, cols):
    """Zero-pad a 2-D array to (rows, cols); no-op (no XLA pad) if aligned."""
    pr, pc = rows - a.shape[0], cols - a.shape[1]
    if pr == 0 and pc == 0:
        return a
    return jnp.pad(a, ((0, pr), (0, pc)))


def _vmem_limit_bytes():
    """Generation-dependent VMEM budget (~84% of per-core capacity)."""
    try:
        cap = pltpu.get_tpu_info().vmem_capacity_bytes
    except Exception:
        cap = 64 * 1024 * 1024  # conservative: v7x has 64 MiB per TensorCore
    return int(cap * 0.84)


# ----------------------------------------------------------------------------
# Kernels
# ----------------------------------------------------------------------------
def _residual_mlp_resident_kernel(x_ref, w1_ref, b1_ref, w2_ref, b2_ref, o_ref,
                                  *, approximate_gelu):
    """Weights fully VMEM-resident; one (tm, dim) token tile per grid step.

        o = GELU(x @ W1 + b1) @ W2 + b2 + x
    """
    x = x_ref[...]                                            # (tm, dim_p) native dtype

    # First matmul: native-dtype operands on the MXU, f32 accumulate.
    h = jnp.dot(x, w1_ref[...], preferred_element_type=jnp.float32)
    h = h + b1_ref[...].astype(jnp.float32)
    h = jax.nn.gelu(h, approximate=approximate_gelu)          # f32 activation (EUP)

    # Second matmul: keep bf16 models on the bf16 MXU path, f32 accumulate.
    mm_dtype = jnp.promote_types(x_ref.dtype, w2_ref.dtype)
    y = jnp.dot(h.astype(mm_dtype), w2_ref[...], preferred_element_type=jnp.float32)

    y = y + b2_ref[...].astype(jnp.float32) + x.astype(jnp.float32)  # Residual add
    o_ref[...] = y.astype(o_ref.dtype)


def _residual_mlp_streamed_kernel(x_ref, w1_ref, b1_ref, w2_ref, b2_ref, o_ref,
                                  acc_ref, *, approximate_gelu):
    """Streamed-weight fallback: grid axis 1 walks hidden chunks.

        acc += GELU(x @ W1[:, k] + b1[k]) @ W2[k, :]
        last chunk:  o = acc + b2 + x
    """
    k = pl.program_id(1)

    @pl.when(k == 0)
    def _():
        acc_ref[...] = jnp.zeros_like(acc_ref)

    x = x_ref[...]                                            # (tm, dim_p)

    h = jnp.dot(x, w1_ref[...], preferred_element_type=jnp.float32)
    h = h + b1_ref[...].astype(jnp.float32)                   # (tm, th)
    h = jax.nn.gelu(h, approximate=approximate_gelu)

    mm_dtype = jnp.promote_types(x_ref.dtype, w2_ref.dtype)
    acc_ref[...] += jnp.dot(h.astype(mm_dtype), w2_ref[...],
                            preferred_element_type=jnp.float32)

    @pl.when(k == pl.num_programs(1) - 1)
    def _():
        y = acc_ref[...] + b2_ref[...].astype(jnp.float32) + x.astype(jnp.float32)
        o_ref[...] = y.astype(o_ref.dtype)


# ----------------------------------------------------------------------------
# Wrapper
# ----------------------------------------------------------------------------
@functools.partial(
    jax.jit,
    static_argnames=("tm", "th", "approximate_gelu", "force_streamed"))
def residual_forward(x, w1, b1, w2, b2, *, tm=None, th=None,
                     approximate_gelu=True, force_streamed=False):
    """x: (batch, seq, dim).  Returns fn(x) + x with fn = MLP(dim->hidden->dim).

    approximate_gelu=True  -> tanh GELU (common ViT choice);
    approximate_gelu=False -> exact erf GELU (PyTorch nn.GELU() default parity).
    """
    batch, seq, dim = x.shape
    hidden = w1.shape[1]
    tokens = batch * seq
    out_dtype = x.dtype
    x_isz = jnp.dtype(x.dtype).itemsize
    w_isz = jnp.dtype(w1.dtype).itemsize

    vmem_limit = _vmem_limit_bytes()
    small_vmem = vmem_limit < 80 * 1024 * 1024            # v7x-class (64 MiB/TC)

    # --- static padded / tiled geometry -------------------------------------
    dim_p = _round_up(dim, 128)                            # lane-dense last dim
    hid_p = _round_up(hidden, 128)

    if tm is None:
        # Streamed arithmetic intensity ~= tm FLOP/byte; keep it above the HBM
        # ridge (v7x ~310, v6e ~650).  For the resident path this is just a
        # pipeline-friendly MXU tile.
        tm = 512 if small_vmem else 768
    tm_eff = min(tm, _round_up(tokens, 8))
    # Prefer >=2 token tiles so both v7x TensorCores get work on the
    # "parallel" axis even for small batches.
    if tokens > 8 and _round_up(tokens, tm_eff) // tm_eff == 1:
        tm_eff = _round_up((tokens + 1) // 2, 8)
    tok_p = _round_up(tokens, tm_eff)
    n_tok_tiles = tok_p // tm_eff

    # --- resident vs streamed weights ----------------------------------------
    # Conservative resident-path VMEM estimate: assume every input spec is
    # double-buffered (even the constant-index weight blocks, which are only
    # fetched once) plus the f32 GELU intermediate / matmul accumulator that
    # live as compiler scratch.
    resident_bytes = (
        2 * tm_eff * dim_p * x_isz            # x tile (double-buffered)
        + 2 * tm_eff * dim_p * x_isz          # out tile (double-buffered)
        + 2 * 2 * dim_p * hid_p * w_isz       # W1 + W2
        + 2 * (hid_p + dim_p) * w_isz         # b1 + b2
        + tm_eff * hid_p * 4                  # f32 GELU intermediate
        + tm_eff * dim_p * 4                  # f32 second-matmul accumulator
    )
    use_resident = (not force_streamed) and resident_bytes <= int(0.75 * vmem_limit)

    if use_resident:
        th_eff = hid_p
        grid = (n_tok_tiles,)
    else:
        if th is None:
            # v5e/v6e: fewer, larger hidden chunks to amortize grid-step
            # overhead; v7x: keep the (tm, th) f32 intermediate modest.
            th = 512 if small_vmem else 1536
        th_eff = _round_up(min(th, hid_p), 128)
        hid_p = _round_up(hidden, th_eff)
        grid = (n_tok_tiles, hid_p // th_eff)

    # Zero padding is numerically exact here: padded hidden columns give
    # GELU(0)*0 through W2; padded dim/token entries are sliced off.
    # Weight/bias pads are no-ops for 128-aligned ViT dims.
    x2d = _pad2(x.reshape(tokens, dim), tok_p, dim_p)
    w1_p = _pad2(w1, dim_p, hid_p)
    b1_p = _pad2(b1.reshape(1, hidden), 1, hid_p)
    w2_p = _pad2(w2, hid_p, dim_p)
    b2_p = _pad2(b2.reshape(1, dim), 1, dim_p)

    # --- cost estimate matching the chosen variant ---------------------------
    weight_bytes = (2 * dim_p * hid_p + hid_p + dim_p) * w_isz
    act_bytes = 2 * tok_p * dim_p * x_isz
    cost = pl.CostEstimate(
        flops=4 * tok_p * dim_p * hid_p,                   # two matmuls, 2*M*K*N each
        transcendentals=tok_p * hid_p,                     # GELU per hidden element
        bytes_accessed=(act_bytes + weight_bytes if use_resident
                        else act_bytes + weight_bytes * n_tok_tiles),
    )

    if use_resident:
        out2d = pl.pallas_call(
            functools.partial(_residual_mlp_resident_kernel,
                              approximate_gelu=approximate_gelu),
            out_shape=jax.ShapeDtypeStruct((tok_p, dim_p), out_dtype),
            grid_spec=pltpu.PrefetchScalarGridSpec(
                num_scalar_prefetch=0,
                grid=grid,
                in_specs=[
                    pl.BlockSpec((tm_eff, dim_p), lambda i: (i, 0)),   # x tile
                    pl.BlockSpec((dim_p, hid_p), lambda i: (0, 0)),    # W1 (resident)
                    pl.BlockSpec((1, hid_p), lambda i: (0, 0)),        # b1 (resident)
                    pl.BlockSpec((hid_p, dim_p), lambda i: (0, 0)),    # W2 (resident)
                    pl.BlockSpec((1, dim_p), lambda i: (0, 0)),        # b2 (resident)
                ],
                out_specs=pl.BlockSpec((tm_eff, dim_p), lambda i: (i, 0)),
            ),
            compiler_params=pltpu.CompilerParams(
                dimension_semantics=("parallel",),
                vmem_limit_bytes=vmem_limit,
            ),
            cost_estimate=cost,
        )(x2d, w1_p, b1_p, w2_p, b2_p)
    else:
        out2d = pl.pallas_call(
            functools.partial(_residual_mlp_streamed_kernel,
                              approximate_gelu=approximate_gelu),
            out_shape=jax.ShapeDtypeStruct((tok_p, dim_p), out_dtype),
            grid_spec=pltpu.PrefetchScalarGridSpec(
                num_scalar_prefetch=0,
                grid=grid,
                in_specs=[
                    pl.BlockSpec((tm_eff, dim_p), lambda i, k: (i, 0)),   # x tile
                    pl.BlockSpec((dim_p, th_eff), lambda i, k: (0, k),    # W1 chunk
                                 pipeline_mode=pl.Buffered(3)),
                    pl.BlockSpec((1, th_eff), lambda i, k: (0, k)),       # b1 chunk
                    pl.BlockSpec((th_eff, dim_p), lambda i, k: (k, 0),    # W2 chunk
                                 pipeline_mode=pl.Buffered(3)),
                    pl.BlockSpec((1, dim_p), lambda i, k: (0, 0)),        # b2
                ],
                out_specs=pl.BlockSpec((tm_eff, dim_p), lambda i, k: (i, 0)),
                scratch_shapes=[pltpu.VMEM((tm_eff, dim_p), jnp.float32)],
            ),
            compiler_params=pltpu.CompilerParams(
                dimension_semantics=("parallel", "arbitrary"),
                vmem_limit_bytes=vmem_limit,
            ),
            cost_estimate=cost,
        )(x2d, w1_p, b1_p, w2_p, b2_p)

    if tok_p != tokens or dim_p != dim:
        out2d = out2d[:tokens, :dim]
    return out2d.reshape(batch, seq, dim)


# ----------------------------------------------------------------------------
# Pure-JAX reference and self-test
# ----------------------------------------------------------------------------
def _reference(x, w1, b1, w2, b2, approximate_gelu=True):
    xf = x.astype(jnp.float32)
    h = jax.nn.gelu(xf @ w1.astype(jnp.float32) + b1.astype(jnp.float32),
                    approximate=approximate_gelu)
    return h @ w2.astype(jnp.float32) + b2.astype(jnp.float32) + xf


if __name__ == "__main__":
    # Small ViT-ish shapes: batch=2, seq=8, dim=32, hidden=64.
    batch, seq, dim, hidden = 2, 8, 32, 64

    key = jax.random.PRNGKey(0)
    kx, k1, k2, k3, k4 = jax.random.split(key, 5)

    x = jax.random.normal(kx, (batch, seq, dim), dtype=jnp.float32)
    w1 = jax.random.normal(k1, (dim, hidden), dtype=jnp.float32) * 0.02
    b1 = jax.random.normal(k2, (hidden,), dtype=jnp.float32) * 0.02
    w2 = jax.random.normal(k3, (hidden, dim), dtype=jnp.float32) * 0.02
    b2 = jax.random.normal(k4, (dim,), dtype=jnp.float32) * 0.02

    ref = _reference(x, w1, b1, w2, b2)

    # f32, resident-weight fast path: tight check.
    out = jax.block_until_ready(residual_forward(x, w1, b1, w2, b2))
    assert out.shape == x.shape and out.dtype == x.dtype
    assert jnp.allclose(out, ref, atol=1e-5, rtol=1e-5), "f32 resident mismatch"

    # f32, streamed-weight fallback path (forced): tight check.
    out_s = jax.block_until_ready(
        residual_forward(x, w1, b1, w2, b2, force_streamed=True))
    assert jnp.allclose(out_s, ref, atol=1e-5, rtol=1e-5), "f32 streamed mismatch"

    # bf16: native-dtype MXU matmuls with f32 accumulate; loose check.
    xb = x.astype(jnp.bfloat16)
    w1b, b1b = w1.astype(jnp.bfloat16), b1.astype(jnp.bfloat16)
    w2b, b2b = w2.astype(jnp.bfloat16), b2.astype(jnp.bfloat16)
    out_bf = jax.block_until_ready(residual_forward(xb, w1b, b1b, w2b, b2b))
    ref_bf = _reference(xb, w1b, b1b, w2b, b2b)
    assert out_bf.dtype == jnp.bfloat16
    assert jnp.allclose(out_bf.astype(jnp.float32), ref_bf, atol=5e-2, rtol=5e-2), \
        "bf16 mismatch vs reference"

    print("KERNEL_OK")
</pallas_src>

<mosaic_0001>
module attributes {stable_mosaic.version = 11 : i64} {
  func.func @_residual_mlp_resident_kernel(%arg0: i32, %arg1: memref<8x128xf32, #tpu.memory_space<vmem>>, %arg2: memref<128x128xf32, #tpu.memory_space<vmem>>, %arg3: memref<1x128xf32, #tpu.memory_space<vmem>>, %arg4: memref<128x128xf32, #tpu.memory_space<vmem>>, %arg5: memref<1x128xf32, #tpu.memory_space<vmem>>, %arg6: memref<8x128xf32, #tpu.memory_space<vmem>>) attributes {dimension_semantics = [#tpu.dimension_semantics<parallel>], iteration_bounds = array<i64: 2>, scalar_prefetch = 0 : i64, scratch_operands = 0 : i64, tpu.core_type = #tpu.core_type<tc>, window_params = [{transform_indices = @transform_0, window_bounds = array<i64: 8, 128>}, {pipeline_mode = #tpu.pipeline_mode<synchronous>, transform_indices = @transform_1, window_bounds = array<i64: 128, 128>}, {pipeline_mode = #tpu.pipeline_mode<synchronous>, transform_indices = @transform_2, window_bounds = array<i64: 1, 128>}, {pipeline_mode = #tpu.pipeline_mode<synchronous>, transform_indices = @transform_3, window_bounds = array<i64: 128, 128>}, {pipeline_mode = #tpu.pipeline_mode<synchronous>, transform_indices = @transform_4, window_bounds = array<i64: 1, 128>}, {transform_indices = @transform_5, window_bounds = array<i64: 8, 128>}]} {
    %c0 = arith.constant 0 : index
    %c0_0 = arith.constant 0 : index
    %0 = vector.load %arg1[%c0, %c0_0] : memref<8x128xf32, #tpu.memory_space<vmem>>, vector<8x128xf32>
    %c0_1 = arith.constant 0 : index
    %c0_2 = arith.constant 0 : index
    %1 = vector.load %arg2[%c0_1, %c0_2] : memref<128x128xf32, #tpu.memory_space<vmem>>, vector<128x128xf32>
    %cst = arith.constant dense<0.000000e+00> : vector<8x128xf32>
    %2 = tpu.matmul %0, %1, %cst {dimension_numbers = #tpu.dot_dimension_numbers<[1], [0], [0], [1], [0, 0, 1, 1], [], []>} : vector<8x128xf32>, vector<128x128xf32>, vector<8x128xf32> -> vector<8x128xf32>
    %c0_3 = arith.constant 0 : index
    %c0_4 = arith.constant 0 : index
    %3 = vector.load %arg3[%c0_3, %c0_4] : memref<1x128xf32, #tpu.memory_space<vmem>>, vector<1x128xf32>
    %4 = vector.broadcast %3 : vector<1x128xf32> to vector<8x128xf32>
    %5 = arith.addf %2, %4 : vector<8x128xf32>
    %6 = arith.mulf %5, %5 : vector<8x128xf32>
    %7 = arith.mulf %5, %6 : vector<8x128xf32>
    %cst_5 = arith.constant 4.471500e-02 : f32
    %8 = vector.broadcast %cst_5 : f32 to vector<8x128xf32>
    %9 = arith.mulf %8, %7 : vector<8x128xf32>
    %10 = arith.addf %5, %9 : vector<8x128xf32>
    %cst_6 = arith.constant 0.797884583 : f32
    %11 = vector.broadcast %cst_6 : f32 to vector<8x128xf32>
    %12 = arith.mulf %11, %10 : vector<8x128xf32>
    %13 = math.tanh %12 : vector<8x128xf32>
    %cst_7 = arith.constant 1.000000e+00 : f32
    %14 = vector.broadcast %cst_7 : f32 to vector<8x128xf32>
    %15 = arith.addf %14, %13 : vector<8x128xf32>
    %cst_8 = arith.constant 5.000000e-01 : f32
    %16 = vector.broadcast %cst_8 : f32 to vector<8x128xf32>
    %17 = arith.mulf %16, %15 : vector<8x128xf32>
    %18 = arith.mulf %5, %17 : vector<8x128xf32>
    %c0_9 = arith.constant 0 : index
    %c0_10 = arith.constant 0 : index
    %19 = vector.load %arg4[%c0_9, %c0_10] : memref<128x128xf32, #tpu.memory_space<vmem>>, vector<128x128xf32>
    %cst_11 = arith.constant dense<0.000000e+00> : vector<8x128xf32>
    %20 = tpu.matmul %18, %19, %cst_11 {dimension_numbers = #tpu.dot_dimension_numbers<[1], [0], [0], [1], [0, 0, 1, 1], [], []>} : vector<8x128xf32>, vector<128x128xf32>, vector<8x128xf32> -> vector<8x128xf32>
    %c0_12 = arith.constant 0 : index
    %c0_13 = arith.constant 0 : index
    %21 = vector.load %arg5[%c0_12, %c0_13] : memref<1x128xf32, #tpu.memory_space<vmem>>, vector<1x128xf32>
    %22 = vector.broadcast %21 : vector<1x128xf32> to vector<8x128xf32>
    %23 = arith.addf %20, %22 : vector<8x128xf32>
    %24 = arith.addf %23, %0 : vector<8x128xf32>
    %c0_14 = arith.constant 0 : index
    %c0_15 = arith.constant 0 : index
    %25 = vector.load %arg6[%c0_14, %c0_15] : memref<8x128xf32, #tpu.memory_space<vmem>>, vector<8x128xf32>
    tpu.vector_store %arg6[%c0_14, %c0_15], %24 {strides = array<i32>} : memref<8x128xf32, #tpu.memory_space<vmem>>, vector<8x128xf32>,
    return
  }
  func.func @transform_0(%arg0: i32) -> (i32, i32) {
    %c0_i32 = arith.constant 0 : i32
    %c0_i32_0 = arith.constant 0 : i32
    return %arg0, %c0_i32 : i32, i32
  }
  func.func @transform_1(%arg0: i32) -> (i32, i32) {
    %c0_i32 = arith.constant 0 : i32
    %c0_i32_0 = arith.constant 0 : i32
    %c0_i32_1 = arith.constant 0 : i32
    return %c0_i32, %c0_i32_0 : i32, i32
  }
  func.func @transform_2(%arg0: i32) -> (i32, i32) {
    %c0_i32 = arith.constant 0 : i32
    %c0_i32_0 = arith.constant 0 : i32
    %c0_i32_1 = arith.constant 0 : i32
    return %c0_i32, %c0_i32_0 : i32, i32
  }
  func.func @transform_3(%arg0: i32) -> (i32, i32) {
    %c0_i32 = arith.constant 0 : i32
    %c0_i32_0 = arith.constant 0 : i32
    %c0_i32_1 = arith.constant 0 : i32
    return %c0_i32, %c0_i32_0 : i32, i32
  }
  func.func @transform_4(%arg0: i32) -> (i32, i32) {
    %c0_i32 = arith.constant 0 : i32
    %c0_i32_0 = arith.constant 0 : i32
    %c0_i32_1 = arith.constant 0 : i32
    return %c0_i32, %c0_i32_0 : i32, i32
  }
  func.func @transform_5(%arg0: i32) -> (i32, i32) {
    %c0_i32 = arith.constant 0 : i32
    %c0_i32_0 = arith.constant 0 : i32
    return %arg0, %c0_i32 : i32, i32
  }
}

</mosaic_0001>

<bundles_post_ra>
// kernel: residual_forward.1
= control target key start
LH: loop header
LB: loop body
LE: loop exit
PB: predicated region body
PF: predicated region fallthrough
CT: control target
= control target key end

     0   :  { %s688_s18 = smov 0   ;;  %s834_s0 = inlined_call_operand.vmem [shape: f32[16,128], index: 0, kind: input, shape index: {}]   ;;  %s835_s1 = inlined_call_operand.vmem [shape: f32[128,128], index: 1, kind: input, shape index: {}]   ;;  %s836_s2 = inlined_call_operand.vmem [shape: f32[1,128], index: 2, kind: input, shape index: {}]   ;;  %s837_s3 = inlined_call_operand.vmem [shape: f32[128,128], index: 3, kind: input, shape index: {}]   ;;  %s838_s4 = inlined_call_operand.vmem [shape: f32[1,128], index: 4, kind: input, shape index: {}]   ;;  %s839_s5 = inlined_call_operand.vmem [shape: f32[16,128], index: 5, kind: output, shape index: {}]  }
   0x1 LB: > { %s471_s19 = sadd.s32 4294967295, %s653_s18   ;;  %p475_p0 = scmp.ge.s32.totalorder %s653_s18, 1  ;;  %s653_s18 = sphi %s688_s18, %s15_s18  }
   0x2   : > { %p186_p1 = scmp.lt.s32.totalorder %s653_s18, 3 }
   0x4   : > { %p187_p2 = pnand %p475_p0, %p186_p1 }
   0x5   : > { %v221_v0 = vld [vmem:[%s835_s1] sm:$0xff] (!%p187_p2)  ;;  %v222_v1 = vld [vmem:[%s835_s1 + $0x8] sm:$0xff] (!%p187_p2)  ;;  %v223_v2 = vld [vmem:[%s835_s1 + $0x10] sm:$0xff] (!%p187_p2)  ;;  %v655_v3 = vmov (!%p187_p2), 0.0|0.0   ;;  %vm656_vm0 = vmmov (!%p187_p2), 0   ;;  %v657_v6 = vmov (!%p187_p2), 0.0  }
   0x6   : > { %190 = sbr.rel (%p187_p2) target bundleno = 497 (0x1f1), region = 40  ;;  %586 = vmatprep.subr.bf16.mxu0 (!%p187_p2), %v655_v3  ;;  %v587_v4 = vpack.c.bf16 (!%p187_p2), %v222_v1, %v221_v0  ;;  %v224_v5 = vld [vmem:[%s835_s1 + $0x18] sm:$0xff] (!%p187_p2)  ;;  %548 = vmatprep.mubr.msk.f32.mxu0 (!%p187_p2), %vm656_vm0, %v657_v6  ;;  %v225_v8 = vld [vmem:[%s835_s1 + $0x20] sm:$0xff] (!%p187_p2)  ;;  %v226_v9 = vld [vmem:[%s835_s1 + $0x28] sm:$0xff] (!%p187_p2)  ;;  %p212_p3 = scmp.lt.s32.totalorder (!%p187_p2), %s471_s19, 1 }
   0x7   : > { %610 = vmatprep.subr.bf16.mxu1 (!%p187_p2), %v655_v3  ;;  %583 = vmatprep.mubr.msk.f32.mxu1 (!%p187_p2), %vm656_vm0, %v657_v6  ;;  %v590_v7 = vpack.c.bf16 (!%p187_p2), %v224_v5, %v223_v2  ;;  %v323_v10 = vld [vmem:[%s837_s3] sm:$0xff] (!%p187_p2)  ;;  %v324_v11 = vld [vmem:[%s837_s3 + $0x8] sm:$0xff] (!%p187_p2)  ;;  %v593_v13 = vpack.c.bf16 (!%p187_p2), %v226_v9, %v225_v8  ;;  %v227_v14 = vld [vmem:[%s835_s1 + $0x30] sm:$0xff] (!%p187_p2) }
   0x8   : > { %588 = vmatpush3.bf16.msra.mxu0 (!%p187_p2), %v587_v4  ;;  %v611_v12 = vpack.c.bf16 (!%p187_p2), %v324_v11, %v323_v10  ;;  %v228_v15 = vld [vmem:[%s835_s1 + $0x38] sm:$0xff] (!%p187_p2)  ;;  %v229_v17 = vld [vmem:[%s835_s1 + $0x40] sm:$0xff] (!%p187_p2)  ;;  %v230_v18 = vld [vmem:[%s835_s1 + $0x48] sm:$0xff] (!%p187_p2) }
   0x9   : > { %589 = vmatprep.subr.bf16.mxu0 (!%p187_p2), %v655_v3  ;;  %v596_v16 = vpack.c.bf16 (!%p187_p2), %v228_v15, %v227_v14  ;;  %v599_v19 = vpack.c.bf16 (!%p187_p2), %v230_v18, %v229_v17  ;;  %v231_v20 = vld [vmem:[%s835_s1 + $0x50] sm:$0xff] (!%p187_p2)  ;;  %v232_v21 = vld [vmem:[%s835_s1 + $0x58] sm:$0xff] (!%p187_p2)  ;;  %v233_v23 = vld [vmem:[%s835_s1 + $0x60] sm:$0xff] (!%p187_p2) }
   0xa   : > { %612 = vmatpush3.bf16.msra.mxu1 (!%p187_p2), %v611_v12  ;;  %v602_v22 = vpack.c.bf16 (!%p187_p2), %v232_v21, %v231_v20  ;;  %v234_v24 = vld [vmem:[%s835_s1 + $0x68] sm:$0xff] (!%p187_p2)  ;;  %v235_v26 = vld [vmem:[%s835_s1 + $0x70] sm:$0xff] (!%p187_p2)  ;;  %v236_v27 = vld [vmem:[%s835_s1 + $0x78] sm:$0xff] (!%p187_p2) }
   0xb   : > { %613 = vmatprep.subr.bf16.mxu1 (!%p187_p2), %v655_v3  ;;  %v605_v25 = vpack.c.bf16 (!%p187_p2), %v234_v24, %v233_v23  ;;  %v608_v28 = vpack.c.bf16 (!%p187_p2), %v236_v27, %v235_v26  ;;  %v325_v30 = vld [vmem:[%s837_s3 + $0x10] sm:$0xff] (!%p187_p2)  ;;  %v326_v31 = vld [vmem:[%s837_s3 + $0x18] sm:$0xff] (!%p187_p2)  ;;  %v327_v33 = vld [vmem:[%s837_s3 + $0x20] sm:$0xff] (!%p187_p2) }
   0xc   : > { %591 = vmatpush3.bf16.msra.mxu0 (!%p187_p2), %v590_v7  ;;  %v614_v32 = vpack.c.bf16 (!%p187_p2), %v326_v31, %v325_v30  ;;  %v328_v34 = vld [vmem:[%s837_s3 + $0x28] sm:$0xff] (!%p187_p2)  ;;  %v329_v36 = vld [vmem:[%s837_s3 + $0x30] sm:$0xff] (!%p187_p2)  ;;  %v330_v37 = vld [vmem:[%s837_s3 + $0x38] sm:$0xff] (!%p187_p2) }
   0xd   : > { %592 = vmatprep.subr.bf16.mxu0 %v655_v3  ;;  %s841_s19 = smov (!%p212_p3, %s471_s19), 1  ;;  %v617_v35 = vpack.c.bf16 %v328_v34, %v327_v33  ;;  %v620_v38 = vpack.c.bf16 %v330_v37, %v329_v36  ;;  %v331_v39 = vld [vmem:[%s837_s3 + $0x40] sm:$0xff]  ;;  %v332_v40 = vld [vmem:[%s837_s3 + $0x48] sm:$0xff]  ;;  %v333_v42 = vld [vmem:[%s837_s3 + $0x50] sm:$0xff] }
   0xe   : > { %s476_s8 = sshll.u32 %s841_s19, 3  ;;  %615 = vmatpush3.bf16.msra.mxu1 %v614_v32  ;;  %v623_v41 = vpack.c.bf16 %v332_v40, %v331_v39  ;;  %v334_v43 = vld [vmem:[%s837_s3 + $0x58] sm:$0xff]  ;;  %v335_v45 = vld [vmem:[%s837_s3 + $0x60] sm:$0xff]  ;;  %v336_v46 = vld [vmem:[%s837_s3 + $0x68] sm:$0xff] }
   0xf   : > { %s215_s11 = scalar_lea.vmem %s834_s0, %s476_s8  ;;  %616 = vmatprep.subr.bf16.mxu1 %v655_v3  ;;  %v626_v44 = vpack.c.bf16 %v334_v43, %v333_v42  ;;  %v629_v47 = vpack.c.bf16 %v336_v46, %v335_v45  ;;  %v337_v48 = vld [vmem:[%s837_s3 + $0x70] sm:$0xff]  ;;  %v338_v49 = vld [vmem:[%s837_s3 + $0x78] sm:$0xff]  ;;  %v478_v51 = vld [vmem:[%s836_s2] ss:$0 sm:$0xff]  ;;  %s219_s26 = scalar_lea.vmem %s839_s5, %s476_s8 }
  0x10   : > { %594 = vmatpush3.bf16.msra.mxu0 %v593_v13  ;;  %v220_v29 = vld [vmem:[%s215_s11] sm:$0xff]  ;;  %v632_v50 = vpack.c.bf16 %v338_v49, %v337_v48 }
  0x11   : > { %595 = vmatprep.subr.bf16.mxu0 %v655_v3  ;;  %v479_v0 = vld [vmem:[%s838_s4] ss:$0 sm:$0xff] }
  0x12   : > { %618 = vmatpush3.bf16.msra.mxu1 %v617_v35 }
  0x13   : > { %619 = vmatprep.subr.bf16.mxu1 %v655_v3 }
  0x14   : > { %597 = vmatpush3.bf16.msra.mxu0 %v596_v16 }
  0x15   : > { %598 = vmatprep.subr.bf16.mxu0 %v655_v3 }
  0x16   : > { %621 = vmatpush3.bf16.msra.mxu1 %v620_v38 }
  0x17   : > { %622 = vmatprep.subr.bf16.mxu1 %v655_v3 }
  0x18   : > { %600 = vmatpush3.bf16.msra.mxu0 %v599_v19 }
  0x19   : > { %601 = vmatprep.subr.bf16.mxu0 %v655_v3 }
  0x1a   : > { %624 = vmatpush3.bf16.msra.mxu1 %v623_v41 }
  0x1b   : > { %625 = vmatprep.subr.bf16.mxu1 %v655_v3 }
  0x1c   : > { %603 = vmatpush3.bf16.msra.mxu0 %v602_v22 }
  0x1d   : > { %604 = vmatprep.subr.bf16.mxu0 %v655_v3 }
  0x1e   : > { %627 = vmatpush3.bf16.msra.mxu1 %v626_v44 }
  0x1f   : > { %628 = vmatprep.subr.bf16.mxu1 %v655_v3 }
  0x20   : > { %606 = vmatpush3.bf16.msra.mxu0 %v605_v25 }
  0x21   : > { %607 = vmatprep.subr.bf16.mxu0 %v655_v3 }
  0x22   : > { %630 = vmatpush3.bf16.msra.mxu1 %v629_v47 }
  0x23   : > { %631 = vmatprep.subr.bf16.mxu1 %v655_v3 }
  0x24   : > { %609 = vmatpush3.bf16.msra.mxu0 %v608_v28 }
  0x26   : > { %633 = vmatpush3.bf16.msra.mxu1 %v632_v50 }
  0x27   : > { %549 = vmatmul.mubr.f32.vlgmr.msra.gmra.mrb[0].mxu0 %v220_v29 }
  0xfa   : > { %v310_v52 = vpop.f32.mrb[0].mxu0 }
  0xfb   : > { %v311_v53 = vadd.f32 %v478_v51, %v310_v52  ;;  %v550_v54 = vpop.f32.mrb[1].mxu0 }
  0xfd   : > { %v314_v55 = vmul.f32 %v311_v53, %v311_v53 }
  0xff   : > { %v315_v56 = vmul.f32 %v314_v55, %v311_v53 }
 0x101   : > { %v316_v57 = vmul.f32 0.044715, %v315_v56 }
 0x103   : > { %v317_v58 = vadd.f32 %v316_v57, %v311_v53 }
 0x105   : > { %v318_v59 = vmul.f32 0.7978846, %v317_v58 }
 0x107   : > { %645 = vtanh.f32 %v318_v59 }
 0x111   : > { %v646_v60 = vpop.eup %645 }
 0x112   : > { %v320_v61 = vadd.f32 1.0, %v646_v60 }
 0x114   : > { %v321_v62 = vmul.f32 0.5, %v320_v61 }
 0x116   : > { %v322_v63 = vmul.f32 %v321_v62, %v311_v53 }
 0x118   : > { %584 = vmatmul.mubr.f32.vlgmr.msra.gmra.mrb[0].mxu1 %v322_v63 }
 0x1eb   : > { %v412_v1 = vpop.f32.mrb[0].mxu1 }
 0x1ec   : > { %v413_v2 = vadd.f32 %v479_v0, %v412_v1  ;;  %v585_v3 = vpop.f32.mrb[1].mxu1 }
 0x1ee   : > { %v416_v4 = vadd.f32 %v413_v2, %v220_v29 }
 0x1f0   : > { %417 = vst [vmem:[%s219_s26] sm:$0xff] %v416_v4 }
 0x1f1 PF: > { %s15_s18 = sadd.s32 1, %s653_s18  }
 0x1f2   : > { %p12_p4 = scmp.ge.s32.totalorder %s15_s18, 4  }
 0x1f4   :  { %14 = sbr.rel (!%p12_p4) target bundleno = 1 (0x1), region = 70 }

</bundles_post_ra>
